<compile_context>
chip_gen: v6e
topology: v6e:2x2x1
jax: 0.10.0
libtpu: 0.0.40
codegen_flags: <defaults>
</compile_context>

<pallas_src>
import functools

import jax
import jax.numpy as jnp
from jax.experimental import pallas as pl
from jax.experimental.pallas import tpu as pltpu


def _round_up(a: int, b: int) -> int:
    return (a + b - 1) // b * b


def gcn_agg_kernel(adj_ref, z_ref, dinv_ref, b_ref, o_ref, acc_ref, *,
                   z_resident: bool):
    """Grid = (row tiles of A+I [parallel], contraction tiles [arbitrary]).

    adj_ref : (tile, tile) int8 block of the raw A+I (exact edge counts)
    z_ref   : dinv-prescaled projected features; either the whole (n_pad, h_pad)
              array (VMEM resident) or a (tile, h_pad) block
    dinv_ref: (tile, 1) deg^{-1/2} for this row tile
    b_ref   : (1, h_pad) learned bias
    """
    k = pl.program_id(1)

    @pl.when(k == 0)
    def _():
        acc_ref[...] = jnp.zeros_like(acc_ref)

    tile = adj_ref.shape[1]
    if z_resident:
        start = pl.multiple_of(k * tile, tile)
        z = z_ref[pl.ds(start, tile), :]
    else:
        z = z_ref[...]

    # int8 -> f32 widen is exact (entries are small edge counts); accumulate
    # in f32 on the MXU.
    acc_ref[...] += jnp.dot(adj_ref[...].astype(jnp.float32), z,
                            preferred_element_type=jnp.float32)

    @pl.when(k == pl.num_programs(1) - 1)
    def _():
        # out = D^-1/2 (A+I) D^-1/2 h + b ; right D^-1/2 already folded into z,
        # left D^-1/2 applied here per row tile, then the learned bias.
        o_ref[...] = (dinv_ref[...] * acc_ref[...] + b_ref[...]).astype(o_ref.dtype)


@functools.partial(jax.jit, static_argnames=("tile",))
def gcn_encoder_forward(x, edge_index, weight, bias, *, tile=1024):
    """x: [N, F] f32, edge_index: [2, E] int32, weight: [H, F], bias: [H]."""
    n, _ = x.shape
    hidden = weight.shape[0]
    lane = 128

    # ---- tile / padding geometry ------------------------------------------
    n_lane = _round_up(n, lane)
    tile = max(lane, min(tile, n_lane))
    if n_lane > lane and tile >= n_lane:
        # Keep >= 2 row tiles so v7x's two TensorCores both get work on the
        # "parallel" axis; tiles stay large, so this is harmless on v5e/v6e.
        tile = _round_up(-(-n_lane // 2), lane)
    n_pad = _round_up(n, tile)
    h_pad = _round_up(hidden, lane)

    src = edge_index[0]
    dst = edge_index[1]
    keep = src != dst                 # add_remaining_self_loops drops self loops

    # Degree after self loops and its inverse sqrt, from the edge list (O(E)).
    deg = jnp.zeros((n,), jnp.float32).at[dst].add(keep.astype(jnp.float32)) + 1.0
    dinv = jax.lax.rsqrt(deg)

    # Raw A + I scattered directly at padded size, stored as int8 (lossless:
    # entries are small edge counts).  Normalization is hoisted out, so there
    # are no O(N^2) f32 scaling passes in the wrapper.
    adj = jnp.zeros((n_pad, n_pad), jnp.int8)
    adj = adj.at[dst, src].add(keep.astype(jnp.int8))
    diag = jnp.arange(n, dtype=jnp.int32)
    adj = adj.at[diag, diag].add(jnp.ones((n,), jnp.int8))

    # Projection applied before aggregation (FairVGNN: num_features >> hidden,
    # so streaming h instead of x shrinks the second operand), with the right
    # D^-1/2 folded in:  z = D^-1/2 (x @ W^T).
    h = x.astype(jnp.float32) @ weight.astype(jnp.float32).T
    z = dinv[:, None] * h
    z_p = jnp.zeros((n_pad, h_pad), jnp.float32).at[:n, :hidden].set(z)
    dinv_p = jnp.zeros((n_pad, 1), jnp.float32).at[:n, 0].set(dinv)
    b_p = jnp.zeros((1, h_pad), jnp.float32).at[0, :hidden].set(
        bias.astype(jnp.float32))

    grid = (n_pad // tile, n_pad // tile)

    # Keep z fully VMEM-resident when small (its block index never changes, so
    # it is DMA'd exactly once); otherwise stream (tile, h_pad) blocks.
    z_db_bytes = 2 * n_pad * h_pad * 4
    z_resident = z_db_bytes <= (8 << 20)
    if z_resident:
        z_spec = pl.BlockSpec((n_pad, h_pad), lambda i, k: (0, 0))
    else:
        z_spec = pl.BlockSpec((tile, h_pad), lambda i, k: (k, 0))

    # VMEM budget: real double-buffered footprint + the widened f32 A tile the
    # compiler materializes for the MXU, plus headroom; capped well under
    # v7x's 64 MiB physical VMEM.
    footprint = (2 * tile * tile                               # int8 A tiles (x2 buf)
                 + tile * tile * 4                             # widened f32 A tile
                 + (z_db_bytes if z_resident else 2 * tile * h_pad * 4)
                 + 2 * tile * h_pad * 4                        # output tiles
                 + tile * h_pad * 4                            # f32 accumulator
                 + 2 * (tile + h_pad) * 4)                     # dinv + bias
    vmem_limit = int(min(max(footprint + (4 << 20), 16 << 20), 40 << 20))

    kernel = functools.partial(gcn_agg_kernel, z_resident=z_resident)

    out = pl.pallas_call(
        kernel,
        out_shape=jax.ShapeDtypeStruct((n_pad, h_pad), jnp.float32),
        grid_spec=pltpu.PrefetchScalarGridSpec(
            num_scalar_prefetch=0,
            grid=grid,
            in_specs=[
                pl.BlockSpec((tile, tile), lambda i, k: (i, k)),   # A + I (int8)
                z_spec,                                            # dinv * (x @ W^T)
                pl.BlockSpec((tile, 1), lambda i, k: (i, 0)),      # dinv rows
                pl.BlockSpec((1, h_pad), lambda i, k: (0, 0)),     # bias
            ],
            out_specs=pl.BlockSpec((tile, h_pad), lambda i, k: (i, 0)),
            scratch_shapes=[pltpu.VMEM((tile, h_pad), jnp.float32)],
        ),
        compiler_params=pltpu.CompilerParams(
            dimension_semantics=("parallel", "arbitrary"),
            vmem_limit_bytes=vmem_limit,
        ),
    )(adj, z_p, dinv_p, b_p)

    return out[:n, :hidden]


def reference_forward(x, edge_index, weight, bias):
    """Pure-JAX mirror of GCN_encoder_scatter.forward (edge-list scatter form)."""
    n = x.shape[0]
    h = x @ weight.T                                   # Linear, no bias
    src, dst = edge_index[0], edge_index[1]
    keep = (src != dst).astype(jnp.float32)
    loop = jnp.arange(n, dtype=edge_index.dtype)
    row = jnp.concatenate([src, loop])
    col = jnp.concatenate([dst, loop])
    w = jnp.concatenate([keep, jnp.ones((n,), jnp.float32)])
    deg = jnp.zeros((n,), jnp.float32).at[col].add(w)  # degree(col)
    dinv = deg ** -0.5
    ew = dinv[row] * dinv[col] * w
    out = jnp.zeros((n, h.shape[1]), h.dtype).at[col].add(ew[:, None] * h[row])
    return out + bias


def _run_case(key, n, f, hidden, e):
    kx, ke, kw, kb = jax.random.split(key, 4)
    x = jax.random.normal(kx, (n, f), dtype=jnp.float32)
    edge_index = jax.random.randint(ke, (2, e), 0, n, dtype=jnp.int32)
    # nn.Linear default uniform(-1/sqrt(F), 1/sqrt(F)); bias is a free Parameter.
    bound = 1.0 / float(f) ** 0.5
    weight = jax.random.uniform(kw, (hidden, f), minval=-bound, maxval=bound,
                                dtype=jnp.float32)
    bias = jax.random.uniform(kb, (hidden,), minval=-bound, maxval=bound,
                              dtype=jnp.float32)

    out = gcn_encoder_forward(x, edge_index, weight, bias)
    out = jax.block_until_ready(out)
    ref = reference_forward(x, edge_index, weight, bias)
    assert out.shape == (n, hidden), f"bad output shape {out.shape}"
    assert jnp.allclose(out, ref, atol=1e-4, rtol=1e-3), \
        "kernel mismatch vs pure-JAX GCN reference"


if __name__ == "__main__":
    key = jax.random.PRNGKey(0)
    k1, k2 = jax.random.split(key)

    # Small deterministic problem (single-tile path).
    _run_case(k1, n=16, f=8, hidden=32, e=48)
    # Slightly larger problem exercising the multi-tile grid (2x2), the
    # k==0 / k==last accumulator phases, and the resident-z slicing path.
    _run_case(k2, n=300, f=64, hidden=16, e=1200)

    print("KERNEL_OK")
</pallas_src>

<mosaic_0001>
module attributes {stable_mosaic.version = 11 : i64} {
  func.func private @main(%arg0: i32) attributes {dimension_semantics = [#tpu.dimension_semantics<core_parallel>], iteration_bounds = array<i64: 2>, tpu.core_type = #tpu.core_type<sc_scalar_subcore>, window_params = []} {
    return
  }
}

module attributes {stable_mosaic.version = 11 : i64} {
  func.func private @main(%arg0: i32) attributes {dimension_semantics = [#tpu.dimension_semantics<core_parallel>], iteration_bounds = array<i64: 2>, tpu.core_type = #tpu.core_type<sc_scalar_subcore>, window_params = []} {
    return
  }
}

module attributes {stable_mosaic.version = 11 : i64} {
  func.func @gcn_agg_kernel(%arg0: i32, %arg1: i32, %arg2: memref<128x128xi8, #tpu.memory_space<vmem>>, %arg3: memref<128x128xf32, #tpu.memory_space<vmem>>, %arg4: memref<128x1xf32, #tpu.memory_space<vmem>>, %arg5: memref<1x128xf32, #tpu.memory_space<vmem>>, %arg6: memref<128x128xf32, #tpu.memory_space<vmem>>, %arg7: memref<128x128xf32, #tpu.memory_space<vmem>>) attributes {dimension_semantics = [#tpu.dimension_semantics<parallel>, #tpu.dimension_semantics<arbitrary>], iteration_bounds = array<i64: 1, 1>, scalar_prefetch = 0 : i64, scratch_operands = 1 : i64, tpu.core_type = #tpu.core_type<tc>, window_params = [{transform_indices = @transform_0, window_bounds = array<i64: 128, 128>}, {pipeline_mode = #tpu.pipeline_mode<synchronous>, transform_indices = @transform_1, window_bounds = array<i64: 128, 128>}, {transform_indices = @transform_2, window_bounds = array<i64: 128, 1>}, {pipeline_mode = #tpu.pipeline_mode<synchronous>, transform_indices = @transform_3, window_bounds = array<i64: 1, 128>}, {transform_indices = @transform_4, window_bounds = array<i64: 128, 128>}]} {
    %c0_i32 = arith.constant 0 : i32
    %0 = arith.cmpi eq, %arg1, %c0_i32 : i32
    %1 = arith.extui %0 : i1 to i32
    %c0_i32_0 = arith.constant 0 : i32
    %2 = arith.cmpi ne, %1, %c0_i32_0 : i32
    scf.if %2 {
      %cst_9 = arith.constant 0.000000e+00 : f32
      %16 = vector.broadcast %cst_9 : f32 to vector<128x128xf32>
      %c0_10 = arith.constant 0 : index
      %c0_11 = arith.constant 0 : index
      %17 = vector.load %arg7[%c0_10, %c0_11] : memref<128x128xf32, #tpu.memory_space<vmem>>, vector<128x128xf32>
      tpu.vector_store %arg7[%c0_10, %c0_11], %16 {strides = array<i32>} : memref<128x128xf32, #tpu.memory_space<vmem>>, vector<128x128xf32>,
    } else {
    }
    %c128_i32 = arith.constant 128 : i32
    %3 = arith.muli %arg1, %c128_i32 : i32
    %4 = tpu.assume_multiple %3, 128 : i32
    %5 = arith.index_cast %4 : i32 to index
    %c0 = arith.constant 0 : index
    %6 = vector.load %arg3[%5, %c0] : memref<128x128xf32, #tpu.memory_space<vmem>>, vector<128x128xf32>
    %c0_1 = arith.constant 0 : index
    %c0_2 = arith.constant 0 : index
    %7 = vector.load %arg7[%c0_1, %c0_2] : memref<128x128xf32, #tpu.memory_space<vmem>>, vector<128x128xf32>
    %c0_3 = arith.constant 0 : index
    %c0_4 = arith.constant 0 : index
    %8 = vector.load %arg2[%c0_3, %c0_4] : memref<128x128xi8, #tpu.memory_space<vmem>>, vector<128x128xi8>
    %9 = arith.sitofp %8 : vector<128x128xi8> to vector<128x128xf32>
    %cst = arith.constant dense<0.000000e+00> : vector<128x128xf32>
    %10 = tpu.matmul %9, %6, %cst {dimension_numbers = #tpu.dot_dimension_numbers<[1], [0], [0], [1], [0, 0, 1, 1], [], []>} : vector<128x128xf32>, vector<128x128xf32>, vector<128x128xf32> -> vector<128x128xf32>
    %11 = arith.addf %7, %10 : vector<128x128xf32>
    %c0_5 = arith.constant 0 : index
    %c0_6 = arith.constant 0 : index
    %12 = vector.load %arg7[%c0_5, %c0_6] : memref<128x128xf32, #tpu.memory_space<vmem>>, vector<128x128xf32>
    tpu.vector_store %arg7[%c0_5, %c0_6], %11 {strides = array<i32>} : memref<128x128xf32, #tpu.memory_space<vmem>>, vector<128x128xf32>,
    %c0_i32_7 = arith.constant 0 : i32
    %13 = arith.cmpi eq, %arg1, %c0_i32_7 : i32
    %14 = arith.extui %13 : i1 to i32
    %c0_i32_8 = arith.constant 0 : i32
    %15 = arith.cmpi ne, %14, %c0_i32_8 : i32
    scf.if %15 {
      %c0_9 = arith.constant 0 : index
      %c0_10 = arith.constant 0 : index
      %16 = vector.load %arg4[%c0_9, %c0_10] : memref<128x1xf32, #tpu.memory_space<vmem>>, vector<128x1xf32>
      %c0_11 = arith.constant 0 : index
      %c0_12 = arith.constant 0 : index
      %17 = vector.load %arg7[%c0_11, %c0_12] : memref<128x128xf32, #tpu.memory_space<vmem>>, vector<128x128xf32>
      %18 = vector.broadcast %16 : vector<128x1xf32> to vector<128x128xf32>
      %19 = arith.mulf %18, %17 : vector<128x128xf32>
      %c0_13 = arith.constant 0 : index
      %c0_14 = arith.constant 0 : index
      %20 = vector.load %arg5[%c0_13, %c0_14] : memref<1x128xf32, #tpu.memory_space<vmem>>, vector<1x128xf32>
      %21 = vector.broadcast %20 : vector<1x128xf32> to vector<128x128xf32>
      %22 = arith.addf %19, %21 : vector<128x128xf32>
      %c0_15 = arith.constant 0 : index
      %c0_16 = arith.constant 0 : index
      %23 = vector.load %arg6[%c0_15, %c0_16] : memref<128x128xf32, #tpu.memory_space<vmem>>, vector<128x128xf32>
      tpu.vector_store %arg6[%c0_15, %c0_16], %22 {strides = array<i32>} : memref<128x128xf32, #tpu.memory_space<vmem>>, vector<128x128xf32>,
    } else {
    }
    return
  }
  func.func @transform_0(%arg0: i32, %arg1: i32) -> (i32, i32) {
    %c0_i32 = arith.constant 0 : i32
    return %arg0, %arg1 : i32, i32
  }
  func.func @transform_1(%arg0: i32, %arg1: i32) -> (i32, i32) {
    %c0_i32 = arith.constant 0 : i32
    %c0_i32_0 = arith.constant 0 : i32
    %c0_i32_1 = arith.constant 0 : i32
    return %c0_i32, %c0_i32_0 : i32, i32
  }
  func.func @transform_2(%arg0: i32, %arg1: i32) -> (i32, i32) {
    %c0_i32 = arith.constant 0 : i32
    %c0_i32_0 = arith.constant 0 : i32
    return %arg0, %c0_i32 : i32, i32
  }
  func.func @transform_3(%arg0: i32, %arg1: i32) -> (i32, i32) {
    %c0_i32 = arith.constant 0 : i32
    %c0_i32_0 = arith.constant 0 : i32
    %c0_i32_1 = arith.constant 0 : i32
    return %c0_i32, %c0_i32_0 : i32, i32
  }
  func.func @transform_4(%arg0: i32, %arg1: i32) -> (i32, i32) {
    %c0_i32 = arith.constant 0 : i32
    %c0_i32_0 = arith.constant 0 : i32
    return %arg0, %c0_i32 : i32, i32
  }
}

</mosaic_0001>

<bundles_post_ra>
// kernel: gcn_encoder_forward.1
= control target key start
LH: loop header
LB: loop body
LE: loop exit
PB: predicated region body
PF: predicated region fallthrough
CT: control target
= control target key end

     0   :  { %v633_v2 = vmov 0   ;;  %s839_s1 = inlined_call_operand.vmem [shape: f32[128,128], index: 1, kind: input, shape index: {}]   ;;  %s840_s0 = inlined_call_operand.vmem [shape: s8[128,128], index: 0, kind: input, shape index: {}]   ;;  %s841_s2 = inlined_call_operand.vmem [shape: f32[128,1], index: 2, kind: input, shape index: {}]   ;;  %s842_s3 = inlined_call_operand.vmem [shape: f32[1,128], index: 3, kind: input, shape index: {}]   ;;  %s843_s4 = inlined_call_operand.vmem [shape: f32[128,128], index: 4, kind: output, shape index: {}]  }
   0x1   :  { %v54_v0 = vld [vmem:[%s839_s1 + $0x78] sm:$0xff]  ;;  %v53_v1 = vld [vmem:[%s839_s1 + $0x70] sm:$0xff]  ;;  %632 = vset.pattern.permute.xlu1 %v633_v2  ;;  %631 = vset.pattern.permute.xlu0 %v633_v2  ;;  %v52_v3 = vld [vmem:[%s839_s1 + $0x68] sm:$0xff] }
   0x2   :  { %535 = vmatprep.subr.mxu0 %v54_v0  ;;  %591 = vmatprep.subr.mxu1 %v54_v0  ;;  %v51_v4 = vld [vmem:[%s839_s1 + $0x60] sm:$0xff]  ;;  %v50_v5 = vld [vmem:[%s839_s1 + $0x58] sm:$0xff]  ;;  %v49_v6 = vld [vmem:[%s839_s1 + $0x50] sm:$0xff] }
   0x3   :  { %536 = vmatpush3.msra.mxu0 %v54_v0  ;;  %607 = vmatpush3.msra.mxu1 %v54_v0  ;;  %v48_v7 = vld [vmem:[%s839_s1 + $0x48] sm:$0xff]  ;;  %v47_v8 = vld [vmem:[%s839_s1 + $0x40] sm:$0xff]  ;;  %v46_v9 = vld [vmem:[%s839_s1 + $0x38] sm:$0xff] }
   0x4   :  { %537 = vmatprep.subr.mxu0 %v53_v1  ;;  %592 = vmatprep.subr.mxu1 %v53_v1  ;;  %v45_v10 = vld [vmem:[%s839_s1 + $0x30] sm:$0xff]  ;;  %v44_v11 = vld [vmem:[%s839_s1 + $0x28] sm:$0xff]  ;;  %v43_v12 = vld [vmem:[%s839_s1 + $0x20] sm:$0xff] }
   0x5   :  { %538 = vmatpush3.msra.mxu0 %v53_v1  ;;  %608 = vmatpush3.msra.mxu1 %v53_v1  ;;  %v42_v13 = vld [vmem:[%s839_s1 + $0x18] sm:$0xff]  ;;  %v472_v14 = vld [vmem:[%s840_s0] sm:$0xff]   ;;  %v626_v15 = vld [vmem:[%s840_s0 + $0x10] sm:$0xff]  }
   0x6   :  { %539 = vmatprep.subr.mxu0 %v52_v3  ;;  %593 = vmatprep.subr.mxu1 %v52_v3  ;;  %v41_v16 = vld [vmem:[%s839_s1 + $0x10] sm:$0xff]  ;;  %v473_v17 = vunpack.c.0.s8 %v472_v14  ;;  %v489_v18 = vunpack.c.0.s8 %v626_v15  ;;  %v40_v19 = vld [vmem:[%s839_s1 + $0x8] sm:$0xff]  ;;  %v474_v20 = vunpack.c.1.s8 %v472_v14  ;;  %v490_v21 = vunpack.c.1.s8 %v626_v15  ;;  %v39_v24 = vld [vmem:[%s839_s1] sm:$0xff] }
   0x7   :  { %540 = vmatpush3.msra.mxu0 %v52_v3  ;;  %609 = vmatpush3.msra.mxu1 %v52_v3  ;;  %v477_v22 = vunpack.c.2.s8 %v472_v14  ;;  %v493_v23 = vunpack.c.2.s8 %v626_v15  ;;  %v624_v25 = vld [vmem:[%s840_s0 + $0x8] sm:$0xff]   ;;  %v628_v26 = vld [vmem:[%s840_s0 + $0x18] sm:$0xff]   ;;  %v478_v31 = vunpack.c.3.s8 %v472_v14  ;;  %v494_v32 = vunpack.c.3.s8 %v626_v15  ;;  %v301_v37 = vld [vmem:[%s841_s2 + $0x10] sm:$0xff] }
   0x8   :  { %541 = vmatprep.subr.mxu0 %v51_v4  ;;  %594 = vmatprep.subr.mxu1 %v51_v4  ;;  %v103_v27 = vcvt.s32.f32 %v473_v17  ;;  %v111_v28 = vcvt.s32.f32 %v489_v18  ;;  %v104_v29 = vcvt.s32.f32 %v474_v20  ;;  %v112_v30 = vcvt.s32.f32 %v490_v21  ;;  %v299_v38 = vld [vmem:[%s841_s2] sm:$0xff]  ;;  %v302_v47 = vld [vmem:[%s841_s2 + $0x18] sm:$0xff]  ;;  %v300_v48 = vld [vmem:[%s841_s2 + $0x8] sm:$0xff] }
   0x9   :  { %542 = vmatpush3.msra.mxu0 %v51_v4  ;;  %610 = vmatpush3.msra.mxu1 %v51_v4  ;;  %v105_v33 = vcvt.s32.f32 %v477_v22  ;;  %v113_v34 = vcvt.s32.f32 %v493_v23  ;;  %v481_v35 = vunpack.c.0.s8 %v624_v25  ;;  %v497_v36 = vunpack.c.0.s8 %v628_v26  ;;  %v304_v55 = vld [vmem:[%s841_s2 + $0x28] sm:$0xff]  ;;  %v303_v56 = vld [vmem:[%s841_s2 + $0x20] sm:$0xff]  ;;  %v306_v59 = vld [vmem:[%s841_s2 + $0x38] sm:$0xff] }
   0xa   :  { %543 = vmatprep.subr.mxu0 %v50_v5  ;;  %595 = vmatprep.subr.mxu1 %v50_v5  ;;  %v106_v39 = vcvt.s32.f32 %v478_v31  ;;  %v114_v40 = vcvt.s32.f32 %v494_v32  ;;  %v482_v41 = vunpack.c.1.s8 %v624_v25  ;;  %v498_v42 = vunpack.c.1.s8 %v628_v26  ;;  %v305_v60 = vld [vmem:[%s841_s2 + $0x30] sm:$0xff]  ;;  %v308_v61 = vld [vmem:[%s841_s2 + $0x48] sm:$0xff]  ;;  %v307_v62 = vld [vmem:[%s841_s2 + $0x40] sm:$0xff] }
   0xb   :  { %544 = vmatpush3.msra.mxu0 %v50_v5  ;;  %611 = vmatpush3.msra.mxu1 %v50_v5  ;;  %v107_v43 = vcvt.s32.f32 %v481_v35  ;;  %v115_v44 = vcvt.s32.f32 %v497_v36  ;;  %v485_v45 = vunpack.c.2.s8 %v624_v25  ;;  %v501_v46 = vunpack.c.2.s8 %v628_v26  ;;  %v310_v63 = vld [vmem:[%s841_s2 + $0x58] sm:$0xff]  ;;  %v309_v0 = vld [vmem:[%s841_s2 + $0x50] sm:$0xff]  ;;  %v312_v1 = vld [vmem:[%s841_s2 + $0x68] sm:$0xff] }
   0xc   :  { %545 = vmatprep.subr.mxu0 %v49_v6  ;;  %596 = vmatprep.subr.mxu1 %v49_v6  ;;  %v108_v49 = vcvt.s32.f32 %v482_v41  ;;  %v116_v50 = vcvt.s32.f32 %v498_v42  ;;  %v486_v51 = vunpack.c.3.s8 %v624_v25  ;;  %v502_v52 = vunpack.c.3.s8 %v628_v26  ;;  %v311_v2 = vld [vmem:[%s841_s2 + $0x60] sm:$0xff]  ;;  %v314_v3 = vld [vmem:[%s841_s2 + $0x78] sm:$0xff]  ;;  %v313_v4 = vld [vmem:[%s841_s2 + $0x70] sm:$0xff] }
   0xd   :  { %546 = vmatpush3.msra.mxu0 %v49_v6  ;;  %612 = vmatpush3.msra.mxu1 %v49_v6  ;;  %v109_v53 = vcvt.s32.f32 %v485_v45  ;;  %v117_v54 = vcvt.s32.f32 %v501_v46  ;;  %v772_v17 = vld [vmem:[%s842_s3] ss:$0 sm:$0xff] }
   0xe   :  { %547 = vmatprep.subr.mxu0 %v48_v7  ;;  %597 = vmatprep.subr.mxu1 %v48_v7  ;;  %v110_v57 = vcvt.s32.f32 %v486_v51  ;;  %v118_v58 = vcvt.s32.f32 %v502_v52 }
   0xf   :  { %548 = vmatpush3.msra.mxu0 %v48_v7  ;;  %613 = vmatpush3.msra.mxu1 %v48_v7 }
  0x10   :  { %549 = vmatprep.subr.mxu0 %v47_v8  ;;  %598 = vmatprep.subr.mxu1 %v47_v8 }
  0x11   :  { %550 = vmatpush3.msra.mxu0 %v47_v8  ;;  %614 = vmatpush3.msra.mxu1 %v47_v8 }
  0x12   :  { %551 = vmatprep.subr.mxu0 %v46_v9  ;;  %599 = vmatprep.subr.mxu1 %v46_v9 }
  0x13   :  { %552 = vmatpush3.msra.mxu0 %v46_v9  ;;  %615 = vmatpush3.msra.mxu1 %v46_v9 }
  0x14   :  { %553 = vmatprep.subr.mxu0 %v45_v10  ;;  %600 = vmatprep.subr.mxu1 %v45_v10 }
  0x15   :  { %554 = vmatpush3.msra.mxu0 %v45_v10  ;;  %616 = vmatpush3.msra.mxu1 %v45_v10 }
  0x16   :  { %555 = vmatprep.subr.mxu0 %v44_v11  ;;  %601 = vmatprep.subr.mxu1 %v44_v11 }
  0x17   :  { %556 = vmatpush3.msra.mxu0 %v44_v11  ;;  %617 = vmatpush3.msra.mxu1 %v44_v11 }
  0x18   :  { %557 = vmatprep.subr.mxu0 %v43_v12  ;;  %602 = vmatprep.subr.mxu1 %v43_v12 }
  0x19   :  { %558 = vmatpush3.msra.mxu0 %v43_v12  ;;  %618 = vmatpush3.msra.mxu1 %v43_v12 }
  0x1a   :  { %559 = vmatprep.subr.mxu0 %v42_v13  ;;  %603 = vmatprep.subr.mxu1 %v42_v13 }
  0x1b   :  { %560 = vmatpush3.msra.mxu0 %v42_v13  ;;  %619 = vmatpush3.msra.mxu1 %v42_v13 }
  0x1c   :  { %561 = vmatprep.subr.mxu0 %v41_v16  ;;  %604 = vmatprep.subr.mxu1 %v41_v16 }
  0x1d   :  { %562 = vmatpush3.msra.mxu0 %v41_v16  ;;  %620 = vmatpush3.msra.mxu1 %v41_v16 }
  0x1e   :  { %563 = vmatprep.subr.mxu0 %v40_v19  ;;  %605 = vmatprep.subr.mxu1 %v40_v19 }
  0x1f   :  { %564 = vmatpush3.msra.mxu0 %v40_v19  ;;  %621 = vmatpush3.msra.mxu1 %v40_v19 }
  0x20   :  { %565 = vmatprep.subr.mxu0 %v39_v24  ;;  %606 = vmatprep.subr.mxu1 %v39_v24 }
  0x21   :  { %566 = vmatpush3.msra.mxu0 %v39_v24  ;;  %622 = vmatpush3.msra.mxu1 %v39_v24 }
  0x22   :  { %567 = vmatprep.mubr.f32.mxu0 %v103_v27  ;;  %579 = vmatprep.mubr.f32.mxu1 %v111_v28 }
  0x23   :  { %568 = vmatmul.mubr.f32.vlgmr.msra.gmra.mxu0 %v104_v29  ;;  %580 = vmatmul.mubr.f32.vlgmr.msra.gmra.mxu1 %v112_v30 }
  0x24   :  { %570 = vmatprep.mubr.f32.mxu0 %v105_v33  ;;  %582 = vmatprep.mubr.f32.mxu1 %v113_v34 }
  0x25   :  { %343 = vperm.xlu1 %632, %v301_v37   ;;  %333 = vperm.xlu0 %631, %v299_v38  }
  0x27   :  { %571 = vmatmul.mubr.f32.gmra.mxu0 %v106_v39  ;;  %583 = vmatmul.mubr.f32.gmra.mxu1 %v114_v40 }
  0x28   :  { %573 = vmatprep.mubr.f32.mxu0 %v107_v43  ;;  %585 = vmatprep.mubr.f32.mxu1 %v115_v44 }
  0x29   :  { %348 = vperm.xlu1 %632, %v302_v47   ;;  %338 = vperm.xlu0 %631, %v300_v48  }
  0x2b   :  { %574 = vmatmul.mubr.f32.gmra.mxu0 %v108_v49  ;;  %586 = vmatmul.mubr.f32.gmra.mxu1 %v116_v50 }
  0x2c   :  { %576 = vmatprep.mubr.f32.mxu0 %v109_v53  ;;  %588 = vmatprep.mubr.f32.mxu1 %v117_v54 }
  0x2d   :  { %358 = vperm.xlu1 %632, %v304_v55   ;;  %353 = vperm.xlu0 %631, %v303_v56  }
  0x2f   :  { %577 = vmatmul.mubr.f32.gmra.mxu0 %v110_v57  ;;  %589 = vmatmul.mubr.f32.gmra.mxu1 %v118_v58 }
  0x31   :  { %368 = vperm.xlu1 %632, %v306_v59   ;;  %363 = vperm.xlu0 %631, %v305_v60  }
  0x35   :  { %378 = vperm.xlu1 %632, %v308_v61   ;;  %373 = vperm.xlu0 %631, %v307_v62  }
  0x39   :  { %388 = vperm.xlu1 %632, %v310_v63   ;;  %383 = vperm.xlu0 %631, %v309_v0  }
  0x3d   :  { %398 = vperm.xlu1 %632, %v312_v1   ;;  %393 = vperm.xlu0 %631, %v311_v2  }
  0x41   :  { %408 = vperm.xlu1 %632, %v314_v3   ;;  %403 = vperm.xlu0 %631, %v313_v4  }
  0xa0   :  { %v344_v5 = vpop.permute.xlu1 %343  ;;  %v334_v6 = vpop.permute.xlu0 %333 }
  0xa4   :  { %v349_v7 = vpop.permute.xlu1 %348  ;;  %v339_v8 = vpop.permute.xlu0 %338 }
  0xa8   :  { %v359_v9 = vpop.permute.xlu1 %358  ;;  %v354_v10 = vpop.permute.xlu0 %353 }
  0xac   :  { %v369_v11 = vpop.permute.xlu1 %368  ;;  %v767_v12 = vpop.permute.xlu0 %363 }
  0xb0   :  { %v379_v13 = vpop.permute.xlu1 %378  ;;  %v374_v14 = vpop.permute.xlu0 %373 }
  0xb4   :  { %v389_v15 = vpop.permute.xlu1 %388  ;;  %v384_v19 = vpop.permute.xlu0 %383 }
  0xb8   :  { %v399_v30 = vpop.permute.xlu1 %398  ;;  %v394_v37 = vpop.permute.xlu0 %393 }
  0xbc   :  { %v409_v50 = vpop.permute.xlu1 %408  ;;  %v404_v57 = vpop.permute.xlu0 %403 }
  0xe3   :  { %v569_v16 = vpop.f32.mrf.mxu0  ;;  %v581_v18 = vpop.f32.mrf.mxu1 }
  0xe4   :  { %v412_v20 = vmul.f32 %v569_v16, %v339_v8  ;;  %v420_v21 = vmul.f32 %v581_v18, %v379_v13 }
  0xe5   :  { %v185_v22 = vpop.f32.mrf.mxu0  ;;  %v225_v23 = vpop.f32.mrf.mxu1 }
  0xe6   :  { %v435_v24 = vadd.f32 %v772_v17, %v412_v20  ;;  %v443_v25 = vadd.f32 %v772_v17, %v420_v21  ;;  %v411_v26 = vmul.f32 %v334_v6, %v185_v22  ;;  %v419_v27 = vmul.f32 %v374_v14, %v225_v23 }
  0xe7   :  { %v572_v28 = vpop.f32.mrf.mxu0  ;;  %v584_v29 = vpop.f32.mrf.mxu1 }
  0xe8   :  { %451 = vst [vmem:[%s843_s4 + $0x8] sm:$0xff] %v435_v24  ;;  %459 = vst [vmem:[%s843_s4 + $0x48] sm:$0xff] %v443_v25  ;;  %v434_v31 = vadd.f32 %v772_v17, %v411_v26  ;;  %v442_v32 = vadd.f32 %v772_v17, %v419_v27  ;;  %v414_v33 = vmul.f32 %v572_v28, %v349_v7 }
  0xe9   :  { %v422_v34 = vmul.f32 %v584_v29, %v389_v15  ;;  %v195_v35 = vpop.f32.mrf.mxu0  ;;  %v235_v36 = vpop.f32.mrf.mxu1 }
  0xea   :  { %450 = vst [vmem:[%s843_s4] sm:$0xff] %v434_v31  ;;  %458 = vst [vmem:[%s843_s4 + $0x40] sm:$0xff] %v442_v32  ;;  %v437_v38 = vadd.f32 %v772_v17, %v414_v33  ;;  %v413_v40 = vmul.f32 %v344_v5, %v195_v35  ;;  %v421_v41 = vmul.f32 %v384_v19, %v235_v36 }
  0xeb   :  { %v445_v39 = vadd.f32 %v772_v17, %v422_v34  ;;  %v575_v42 = vpop.f32.mrf.mxu0  ;;  %v587_v43 = vpop.f32.mrf.mxu1 }
  0xec   :  { %453 = vst [vmem:[%s843_s4 + $0x18] sm:$0xff] %v437_v38  ;;  %v436_v44 = vadd.f32 %v772_v17, %v413_v40  ;;  %v444_v45 = vadd.f32 %v772_v17, %v421_v41  ;;  %v416_v46 = vmul.f32 %v575_v42, %v359_v9  ;;  %v424_v47 = vmul.f32 %v587_v43, %v399_v30 }
  0xed   :  { %461 = vst [vmem:[%s843_s4 + $0x58] sm:$0xff] %v445_v39  ;;  %v205_v48 = vpop.f32.mrf.mxu0  ;;  %v245_v49 = vpop.f32.mrf.mxu1 }
  0xee   :  { %452 = vst [vmem:[%s843_s4 + $0x10] sm:$0xff] %v436_v44  ;;  %460 = vst [vmem:[%s843_s4 + $0x50] sm:$0xff] %v444_v45  ;;  %v439_v51 = vadd.f32 %v772_v17, %v416_v46  ;;  %v447_v52 = vadd.f32 %v772_v17, %v424_v47  ;;  %v415_v53 = vmul.f32 %v354_v10, %v205_v48 }
  0xef   :  { %v423_v54 = vmul.f32 %v394_v37, %v245_v49  ;;  %v578_v55 = vpop.f32.mrf.mxu0  ;;  %v590_v56 = vpop.f32.mrf.mxu1 }
  0xf0   :  { %455 = vst [vmem:[%s843_s4 + $0x28] sm:$0xff] %v439_v51  ;;  %463 = vst [vmem:[%s843_s4 + $0x68] sm:$0xff] %v447_v52  ;;  %v438_v58 = vadd.f32 %v772_v17, %v415_v53  ;;  %v418_v60 = vmul.f32 %v578_v55, %v369_v11  ;;  %v426_v61 = vmul.f32 %v590_v56, %v409_v50 }
  0xf1   :  { %v446_v59 = vadd.f32 %v772_v17, %v423_v54  ;;  %v215_v62 = vpop.f32.mrf.mxu0  ;;  %v255_v63 = vpop.f32.mrf.mxu1 }
  0xf2   :  { %454 = vst [vmem:[%s843_s4 + $0x20] sm:$0xff] %v438_v58  ;;  %v441_v0 = vadd.f32 %v772_v17, %v418_v60  ;;  %v449_v1 = vadd.f32 %v772_v17, %v426_v61  ;;  %v417_v2 = vmul.f32 %v767_v12, %v215_v62  ;;  %v425_v3 = vmul.f32 %v404_v57, %v255_v63 }
  0xf3   :  { %462 = vst [vmem:[%s843_s4 + $0x60] sm:$0xff] %v446_v59 }
  0xf4   :  { %457 = vst [vmem:[%s843_s4 + $0x38] sm:$0xff] %v441_v0  ;;  %465 = vst [vmem:[%s843_s4 + $0x78] sm:$0xff] %v449_v1  ;;  %v440_v4 = vadd.f32 %v772_v17, %v417_v2  ;;  %v448_v5 = vadd.f32 %v772_v17, %v425_v3 }
  0xf6   :  { %456 = vst [vmem:[%s843_s4 + $0x30] sm:$0xff] %v440_v4  ;;  %464 = vst [vmem:[%s843_s4 + $0x70] sm:$0xff] %v448_v5 }

</bundles_post_ra>
